<compile_context>
chip_gen: v7x
topology: tpu7x:2x2x1
jax: 0.10.0
libtpu: 0.0.40
codegen_flags: <defaults>
</compile_context>

<pallas_src>
import functools

import jax
import jax.numpy as jnp
from jax import lax
from jax.experimental import pallas as pl
from jax.experimental.pallas import tpu as pltpu

NUM_NODES = 33
_BF16 = jnp.bfloat16
_NT_DIMS = (((1,), (1,)), ((), ()))          # contract last dims of both operands: A @ B^T


# ----------------------------- fused Pallas kernel ----------------------------- #

def _stgcn_fused_kernel(x2_ref, adj_ref, w1_ref, bigt_ref, pavg_ref, small_ref,
                        o_ref, *, has_res, eps):
    """Fused relayout + GCN + temporal conv + BatchNorm(train) + ReLU + residual.

    Lane order is (b, c, t) (the flattened NCHW leading dims), so:
      x2_ref:    (B*Cin*T, N)               f32  -- free reshape of the NCHW input
      adj_ref:   (N, N)                     f32
      w1_ref:    ([2*]B*Cin*T, B*Cout*T)    bf16 -- [big_r stacked over big_w] / big_w
      bigt_ref:  (B*Cout*T, B*Cout*T)       bf16 -- block-banded temporal-conv operator
      pavg_ref:  (B*Cout*T, B*Cout*T)       f32  -- per-channel reduce+broadcast / (B*T*N)
      small_ref: (4 or 5, B*Cout*T)         f32  -- [b_res,] b_gcn, b_tcn, gamma, beta (per lane)
      o_ref:     (N, B*Cout*T)              f32  -- lane-dense node-major output
    """
    l_in = x2_ref.shape[0]
    n = adj_ref.shape[0]
    x2 = x2_ref[...]

    # --- relayout + adjacency aggregation, both on the MXU (no transpose op needed) ---
    rows = lax.broadcasted_iota(jnp.int32, (n, n), 0)
    cols = lax.broadcasted_iota(jnp.int32, (n, n), 1)
    eye_n = (rows == cols).astype(jnp.float32)
    x_nl = lax.dot_general(eye_n, x2, _NT_DIMS,
                           preferred_element_type=jnp.float32)          # (N, L_in) = x2^T
    ax = lax.dot_general(adj_ref[...], x2, _NT_DIMS,
                         preferred_element_type=jnp.float32)            # (N, L_in) = adj @ x2^T

    # --- packed small per-lane operands ---
    off = 1 if has_res else 0
    b_gcn_l = small_ref[off + 0:off + 1, :]
    b_tcn_l = small_ref[off + 1:off + 2, :]
    gamma_l = small_ref[off + 2:off + 3, :]
    beta_l = small_ref[off + 3:off + 4, :]

    # --- GCN, reassociated as (adj @ x) @ W ; bf16 MXU operands, f32 accumulation ---
    h = jnp.dot(ax.astype(_BF16), w1_ref[off * l_in:, :],
                preferred_element_type=jnp.float32) + b_gcn_l
    h = jnp.maximum(h, 0.0)

    # --- residual path ---
    if has_res:
        res = jnp.dot(x_nl.astype(_BF16), w1_ref[:l_in, :],
                      preferred_element_type=jnp.float32) + small_ref[0:1, :]
    else:
        res = x_nl                    # Cin == Cout: identity residual, exact f32 add

    # --- temporal conv: all Kt taps + zero padding folded into ONE matmul ---
    y = jnp.dot(h.astype(_BF16), bigt_ref[...],
                preferred_element_type=jnp.float32) + b_tcn_l

    # --- BatchNorm2d, training-mode batch stats over (B, T, N), biased var ---
    # Single pass over y; p_avg performs the per-channel reduce AND the broadcast
    # back to lanes in one MXU step each (2 tiny matmuls total, f32 for accuracy).
    s1 = jnp.sum(y, axis=0, keepdims=True)
    s2 = jnp.sum(y * y, axis=0, keepdims=True)
    mean_l = jnp.dot(s1, pavg_ref[...], preferred_element_type=jnp.float32)
    ey2_l = jnp.dot(s2, pavg_ref[...], preferred_element_type=jnp.float32)
    var_l = ey2_l - mean_l * mean_l          # fine at the required tolerance (f32)
    scale_l = gamma_l * lax.rsqrt(var_l + eps)
    shift_l = beta_l - mean_l * scale_l
    y = jnp.maximum(y * scale_l + shift_l, 0.0)

    o_ref[...] = y + res                     # lane-dense, full-width unmasked stores


# -------------------- parameter -> kernel-operand precomputation -------------------- #

def prepare_kernel_operands(params, *, B, T, n_nodes=NUM_NODES):
    """Precompute the block operators once (depends only on params and static B, T)."""
    w_gcn = params["w_gcn"]
    Cin, Cout = w_gcn.shape
    w_tcn = params["w_tcn"]                  # (Kt, ci, co)
    Kt = w_tcn.shape[0]
    pad = (Kt - 1) // 2
    L_in, L_out = B * Cin * T, B * Cout * T

    eye_B = jnp.eye(B, dtype=jnp.float32)
    eye_T = jnp.eye(T, dtype=jnp.float32)

    def lanes(v, C):                         # per-channel vector -> per-lane row, (b, c, t) order
        return jnp.broadcast_to(v.reshape(1, C, 1), (B, C, T)).reshape(1, B * C * T)

    # GCN weight as a block operator on (b, c, t) lanes:  I_B (x) W (x) I_T
    big_w = jnp.einsum("bd,io,tu->bitdou", eye_B, w_gcn, eye_T).reshape(L_in, L_out)

    # Temporal conv: y[., (b,o,t)] = sum_{k,i} h[., (b,i,t+k-pad)] * w_tcn[k,i,o]
    # (zero padding handled by the banded structure).  NOTE: O((B*T*Cout)^2) memory;
    # switch to per-tap shifted matmuls before scaling B*T*Cout up (v7x VMEM = 64 MiB).
    tm4 = jnp.zeros((Cout, T, Cout, T), jnp.float32)
    for kk in range(Kt):
        shift = jnp.eye(T, T, k=-(kk - pad), dtype=jnp.float32)   # [t_in, t_out]=1 iff t_in==t_out+(kk-pad)
        tm4 = tm4 + jnp.einsum("ut,io->iuot", shift, w_tcn[kk])
    big_t = jnp.einsum("bd,iuot->biudot", eye_B, tm4).reshape(L_out, L_out)

    # BatchNorm channel-average operator (reduce over same-channel lanes + broadcast back).
    p_avg = jnp.einsum("bd,co,tu->bctdou",
                       jnp.ones((B, B), jnp.float32),
                       jnp.eye(Cout, dtype=jnp.float32),
                       jnp.ones((T, T), jnp.float32)).reshape(L_out, L_out)
    p_avg = p_avg * (1.0 / float(B * T * n_nodes))

    rows = [lanes(params["b_gcn"], Cout), lanes(params["b_tcn"], Cout),
            lanes(params["bn_gamma"], Cout), lanes(params["bn_beta"], Cout)]
    if Cin != Cout:
        big_r = jnp.einsum("bd,io,tu->bitdou", eye_B, params["w_res"], eye_T).reshape(L_in, L_out)
        w1 = jnp.concatenate([big_r, big_w], axis=0)             # (2*L_in, L_out)
        rows = [lanes(params["b_res"], Cout)] + rows
    else:
        w1 = big_w                                               # (L_in, L_out)

    return dict(w1=w1.astype(_BF16),            # bf16: halves DMA, bf16-native MXU
                big_t=big_t.astype(_BF16),
                p_avg=p_avg,                    # f32 for BN accuracy
                small=jnp.concatenate(rows, axis=0))


# ------------------------------------ forward ------------------------------------ #

def stgcn_block_forward(x_nchw, adj, kop):
    """Forward of STGCNBlock.  x_nchw: (B, C_in, T, N) float32, adj: (N, N)."""
    B, Cin, T, N = x_nchw.shape
    L_in = B * Cin * T
    L_out = kop["big_t"].shape[0]
    Cout = L_out // (B * T)
    has_res = kop["w1"].shape[0] == 2 * L_in

    # Free relayout: NCHW -> (B*Cin*T, N) is a pure reshape (no transpose, no HBM copy);
    # the node-major transpose happens in-kernel on the MXU.
    x2 = x_nchw.reshape(L_in, N).astype(jnp.float32)

    kernel = functools.partial(_stgcn_fused_kernel, has_res=has_res, eps=1e-5)
    args = (x2, adj.astype(jnp.float32), kop["w1"], kop["big_t"], kop["p_avg"], kop["small"])

    flops = (2 * (2 * N * N * L_in                               # relayout + adjacency
                  + (2 if has_res else 1) * N * L_in * L_out     # residual / GCN weight matmuls
                  + N * L_out * L_out                            # temporal conv
                  + 2 * L_out * L_out)                           # BN reduce+broadcast
             + 12 * N * L_out)                                   # element-wise
    bytes_accessed = sum(int(a.size) * a.dtype.itemsize for a in args) + N * L_out * 4

    vmem = pl.BlockSpec(memory_space=pltpu.MemorySpace.VMEM)
    out_nl = pl.pallas_call(
        kernel,
        out_shape=jax.ShapeDtypeStruct((N, L_out), jnp.float32),
        in_specs=[vmem] * len(args),
        out_specs=vmem,
        cost_estimate=pl.CostEstimate(flops=int(flops), transcendentals=int(L_out),
                                      bytes_accessed=int(bytes_accessed)),
    )(*args)

    # out_nl is the lane-dense node-major layout a following stacked block consumes
    # directly (zero transposes between blocks); only the NCHW edge pays this one.
    return jnp.transpose(out_nl).reshape(B, Cout, T, N)


# ----------------------------- deterministic parameters ----------------------------- #

def init_params(key, cin, cout, kt):
    ks = jax.random.split(key, 6)
    # GraphConvolution: uniform(-1/sqrt(out), 1/sqrt(out))
    stdv = 1.0 / (cout ** 0.5)
    w_gcn = jax.random.uniform(ks[0], (cin, cout), jnp.float32, -stdv, stdv)
    b_gcn = jax.random.uniform(ks[1], (cout,), jnp.float32, -stdv, stdv)
    # Conv2d(cout, cout, (kt, 1)) weight (cout, cout, kt, 1) -> stored as (kt, c_in, c_out)
    bound_t = 1.0 / ((cout * kt) ** 0.5)
    w_tcn_pt = jax.random.uniform(ks[2], (cout, cout, kt, 1), jnp.float32, -bound_t, bound_t)
    b_tcn = jax.random.uniform(ks[3], (cout,), jnp.float32, -bound_t, bound_t)
    w_tcn = jnp.transpose(w_tcn_pt[..., 0], (2, 1, 0))
    # BatchNorm2d default init
    bn_gamma = jnp.ones((cout,), jnp.float32)
    bn_beta = jnp.zeros((cout,), jnp.float32)
    # residual 1x1 conv (cout, cin, 1, 1) -> (cin, cout)
    bound_r = 1.0 / (cin ** 0.5)
    w_res_pt = jax.random.uniform(ks[4], (cout, cin, 1, 1), jnp.float32, -bound_r, bound_r)
    b_res = jax.random.uniform(ks[5], (cout,), jnp.float32, -bound_r, bound_r)
    w_res = jnp.transpose(w_res_pt[:, :, 0, 0], (1, 0))
    return dict(w_gcn=w_gcn, b_gcn=b_gcn, w_tcn=w_tcn, b_tcn=b_tcn,
                bn_gamma=bn_gamma, bn_beta=bn_beta, w_res=w_res, b_res=b_res)


# -------------------------------- pure-JAX reference -------------------------------- #

def reference_forward(x_nchw, adj, params, *, temporal_kernel_size):
    B, Cin, T, N = x_nchw.shape
    Kt = temporal_kernel_size
    pad = (Kt - 1) // 2
    Cout = params["w_gcn"].shape[1]
    xl = jnp.transpose(x_nchw, (0, 2, 3, 1)).astype(jnp.float32)
    support = jnp.einsum('btni,io->btno', xl, params["w_gcn"])
    gcn = jnp.einsum('uv,btvo->btuo', adj, support) + params["b_gcn"]
    h = jnp.maximum(gcn, 0.0)
    hp = jnp.pad(h, ((0, 0), (pad, pad), (0, 0), (0, 0)))
    y = sum(jnp.einsum('btni,io->btno', hp[:, k:k + T], params["w_tcn"][k]) for k in range(Kt))
    y = y + params["b_tcn"]
    mean = jnp.mean(y, axis=(0, 1, 2))
    var = jnp.mean((y - mean) ** 2, axis=(0, 1, 2))
    ybn = (y - mean) * jax.lax.rsqrt(var + 1e-5) * params["bn_gamma"] + params["bn_beta"]
    yr = jnp.maximum(ybn, 0.0)
    if Cin != Cout:
        res = jnp.einsum('btni,io->btno', xl, params["w_res"]) + params["b_res"]
    else:
        res = xl
    return jnp.transpose(yr + res, (0, 3, 1, 2))


# --------------------------------------- main --------------------------------------- #

if __name__ == "__main__":
    key = jax.random.PRNGKey(0)
    kx, ka, kp, kx2, kp2 = jax.random.split(key, 5)

    N, Kt = NUM_NODES, 3
    B, Cin, Cout, T = 2, 4, 8, 8

    x = jax.random.normal(kx, (B, Cin, T, N), dtype=jnp.float32)
    a = jax.random.uniform(ka, (N, N), dtype=jnp.float32)
    a = 0.5 * (a + a.T)
    adj = a / jnp.sum(a, axis=1, keepdims=True)                  # normalized adjacency

    forward = jax.jit(stgcn_block_forward)

    # --- case 1: Cin != Cout (1x1-conv residual path) ---
    params = init_params(kp, Cin, Cout, Kt)
    kop = prepare_kernel_operands(params, B=B, T=T)
    out = jax.block_until_ready(forward(x, adj, kop))
    ref = reference_forward(x, adj, params, temporal_kernel_size=Kt)
    assert out.shape == (B, Cout, T, N), out.shape
    err = float(jnp.max(jnp.abs(out - ref)))
    if not err < 5e-2:
        raise SystemExit(f"mismatch vs reference (cin!=cout): max abs err = {err}")

    # --- case 2: Cin == Cout (identity residual, direct add) ---
    x2 = jax.random.normal(kx2, (B, Cout, T, N), dtype=jnp.float32)
    params2 = init_params(kp2, Cout, Cout, Kt)
    kop2 = prepare_kernel_operands(params2, B=B, T=T)
    out2 = jax.block_until_ready(forward(x2, adj, kop2))
    ref2 = reference_forward(x2, adj, params2, temporal_kernel_size=Kt)
    err2 = float(jnp.max(jnp.abs(out2 - ref2)))
    if not err2 < 5e-2:
        raise SystemExit(f"mismatch vs reference (cin==cout): max abs err = {err2}")

    print("KERNEL_OK")
</pallas_src>

<mosaic_0001>
module attributes {stable_mosaic.version = 11 : i64} {
  func.func @_stgcn_fused_kernel(%arg0: memref<64x33xf32, #tpu.memory_space<vmem>>, %arg1: memref<33x33xf32, #tpu.memory_space<vmem>>, %arg2: memref<128x128xbf16, #tpu.memory_space<vmem>>, %arg3: memref<128x128xbf16, #tpu.memory_space<vmem>>, %arg4: memref<128x128xf32, #tpu.memory_space<vmem>>, %arg5: memref<5x128xf32, #tpu.memory_space<vmem>>, %arg6: memref<33x128xf32, #tpu.memory_space<vmem>>) attributes {dimension_semantics = [], scalar_prefetch = 0 : i64, scratch_operands = 0 : i64, tpu.core_type = #tpu.core_type<tc>} {
    %c0 = arith.constant 0 : index
    %c0_0 = arith.constant 0 : index
    %0 = vector.load %arg0[%c0, %c0_0] : memref<64x33xf32, #tpu.memory_space<vmem>>, vector<64x33xf32>
    %1 = tpu.iota {dimensions = array<i32: 0>} : vector<33x33xi32>
    %2 = tpu.iota {dimensions = array<i32: 1>} : vector<33x33xi32>
    %3 = arith.cmpi eq, %1, %2 : vector<33x33xi32>
    %4 = arith.extui %3 : vector<33x33xi1> to vector<33x33xi32>
    %5 = arith.sitofp %4 : vector<33x33xi32> to vector<33x33xf32>
    %cst = arith.constant dense<0.000000e+00> : vector<33x64xf32>
    %6 = tpu.matmul %5, %0, %cst {dimension_numbers = #tpu.dot_dimension_numbers<[1], [1], [0], [0], [0, 0, 1, 0], [], []>} : vector<33x33xf32>, vector<64x33xf32>, vector<33x64xf32> -> vector<33x64xf32>
    %c0_1 = arith.constant 0 : index
    %c0_2 = arith.constant 0 : index
    %7 = vector.load %arg1[%c0_1, %c0_2] : memref<33x33xf32, #tpu.memory_space<vmem>>, vector<33x33xf32>
    %cst_3 = arith.constant dense<0.000000e+00> : vector<33x64xf32>
    %8 = tpu.matmul %7, %0, %cst_3 {dimension_numbers = #tpu.dot_dimension_numbers<[1], [1], [0], [0], [0, 0, 1, 0], [], []>} : vector<33x33xf32>, vector<64x33xf32>, vector<33x64xf32> -> vector<33x64xf32>
    %c1 = arith.constant 1 : index
    %c0_4 = arith.constant 0 : index
    %9 = vector.load %arg5[%c1, %c0_4] : memref<5x128xf32, #tpu.memory_space<vmem>>, vector<1x128xf32>
    %c2 = arith.constant 2 : index
    %c0_5 = arith.constant 0 : index
    %10 = vector.load %arg5[%c2, %c0_5] : memref<5x128xf32, #tpu.memory_space<vmem>>, vector<1x128xf32>
    %c3 = arith.constant 3 : index
    %c0_6 = arith.constant 0 : index
    %11 = vector.load %arg5[%c3, %c0_6] : memref<5x128xf32, #tpu.memory_space<vmem>>, vector<1x128xf32>
    %c4 = arith.constant 4 : index
    %c0_7 = arith.constant 0 : index
    %12 = vector.load %arg5[%c4, %c0_7] : memref<5x128xf32, #tpu.memory_space<vmem>>, vector<1x128xf32>
    %13 = arith.truncf %8 : vector<33x64xf32> to vector<33x64xbf16>
    %c64 = arith.constant 64 : index
    %c0_8 = arith.constant 0 : index
    %14 = vector.load %arg2[%c64, %c0_8] : memref<128x128xbf16, #tpu.memory_space<vmem>>, vector<64x128xbf16>
    %cst_9 = arith.constant dense<0.000000e+00> : vector<33x128xf32>
    %15 = tpu.matmul %13, %14, %cst_9 {dimension_numbers = #tpu.dot_dimension_numbers<[1], [0], [0], [1], [0, 0, 1, 1], [], []>} : vector<33x64xbf16>, vector<64x128xbf16>, vector<33x128xf32> -> vector<33x128xf32>
    %16 = vector.broadcast %9 : vector<1x128xf32> to vector<33x128xf32>
    %17 = arith.addf %15, %16 : vector<33x128xf32>
    %cst_10 = arith.constant 0.000000e+00 : f32
    %18 = vector.broadcast %cst_10 : f32 to vector<33x128xf32>
    %19 = arith.maximumf %17, %18 : vector<33x128xf32>
    %20 = arith.truncf %6 : vector<33x64xf32> to vector<33x64xbf16>
    %c0_11 = arith.constant 0 : index
    %c0_12 = arith.constant 0 : index
    %21 = vector.load %arg2[%c0_11, %c0_12] : memref<128x128xbf16, #tpu.memory_space<vmem>>, vector<64x128xbf16>
    %cst_13 = arith.constant dense<0.000000e+00> : vector<33x128xf32>
    %22 = tpu.matmul %20, %21, %cst_13 {dimension_numbers = #tpu.dot_dimension_numbers<[1], [0], [0], [1], [0, 0, 1, 1], [], []>} : vector<33x64xbf16>, vector<64x128xbf16>, vector<33x128xf32> -> vector<33x128xf32>
    %c0_14 = arith.constant 0 : index
    %c0_15 = arith.constant 0 : index
    %23 = vector.load %arg5[%c0_14, %c0_15] : memref<5x128xf32, #tpu.memory_space<vmem>>, vector<1x128xf32>
    %24 = vector.broadcast %23 : vector<1x128xf32> to vector<33x128xf32>
    %25 = arith.addf %22, %24 : vector<33x128xf32>
    %26 = arith.truncf %19 : vector<33x128xf32> to vector<33x128xbf16>
    %c0_16 = arith.constant 0 : index
    %c0_17 = arith.constant 0 : index
    %27 = vector.load %arg3[%c0_16, %c0_17] : memref<128x128xbf16, #tpu.memory_space<vmem>>, vector<128x128xbf16>
    %cst_18 = arith.constant dense<0.000000e+00> : vector<33x128xf32>
    %28 = tpu.matmul %26, %27, %cst_18 {dimension_numbers = #tpu.dot_dimension_numbers<[1], [0], [0], [1], [0, 0, 1, 1], [], []>} : vector<33x128xbf16>, vector<128x128xbf16>, vector<33x128xf32> -> vector<33x128xf32>
    %29 = vector.broadcast %10 : vector<1x128xf32> to vector<33x128xf32>
    %30 = arith.addf %28, %29 : vector<33x128xf32>
    %cst_19 = arith.constant dense<0.000000e+00> : vector<128xf32>
    %31 = vector.multi_reduction <add>, %30, %cst_19 [0] : vector<33x128xf32> to vector<128xf32>
    %32 = vector.shape_cast %31 : vector<128xf32> to vector<1x128xf32>
    %33 = arith.mulf %30, %30 : vector<33x128xf32>
    %cst_20 = arith.constant dense<0.000000e+00> : vector<128xf32>
    %34 = vector.multi_reduction <add>, %33, %cst_20 [0] : vector<33x128xf32> to vector<128xf32>
    %35 = vector.shape_cast %34 : vector<128xf32> to vector<1x128xf32>
    %c0_21 = arith.constant 0 : index
    %c0_22 = arith.constant 0 : index
    %36 = vector.load %arg4[%c0_21, %c0_22] : memref<128x128xf32, #tpu.memory_space<vmem>>, vector<128x128xf32>
    %cst_23 = arith.constant dense<0.000000e+00> : vector<1x128xf32>
    %37 = tpu.matmul %32, %36, %cst_23 {dimension_numbers = #tpu.dot_dimension_numbers<[1], [0], [0], [1], [0, 0, 1, 1], [], []>} : vector<1x128xf32>, vector<128x128xf32>, vector<1x128xf32> -> vector<1x128xf32>
    %c0_24 = arith.constant 0 : index
    %c0_25 = arith.constant 0 : index
    %38 = vector.load %arg4[%c0_24, %c0_25] : memref<128x128xf32, #tpu.memory_space<vmem>>, vector<128x128xf32>
    %cst_26 = arith.constant dense<0.000000e+00> : vector<1x128xf32>
    %39 = tpu.matmul %35, %38, %cst_26 {dimension_numbers = #tpu.dot_dimension_numbers<[1], [0], [0], [1], [0, 0, 1, 1], [], []>} : vector<1x128xf32>, vector<128x128xf32>, vector<1x128xf32> -> vector<1x128xf32>
    %40 = arith.mulf %37, %37 : vector<1x128xf32>
    %41 = arith.subf %39, %40 : vector<1x128xf32>
    %cst_27 = arith.constant 9.99999974E-6 : f32
    %42 = vector.broadcast %cst_27 : f32 to vector<1x128xf32>
    %43 = arith.addf %41, %42 : vector<1x128xf32>
    %44 = math.rsqrt %43 : vector<1x128xf32>
    %45 = arith.mulf %11, %44 : vector<1x128xf32>
    %46 = arith.mulf %37, %45 : vector<1x128xf32>
    %47 = arith.subf %12, %46 : vector<1x128xf32>
    %48 = vector.broadcast %45 : vector<1x128xf32> to vector<33x128xf32>
    %49 = arith.mulf %30, %48 : vector<33x128xf32>
    %50 = vector.broadcast %47 : vector<1x128xf32> to vector<33x128xf32>
    %51 = arith.addf %49, %50 : vector<33x128xf32>
    %cst_28 = arith.constant 0.000000e+00 : f32
    %52 = vector.broadcast %cst_28 : f32 to vector<33x128xf32>
    %53 = arith.maximumf %51, %52 : vector<33x128xf32>
    %54 = arith.addf %53, %25 : vector<33x128xf32>
    %c0_29 = arith.constant 0 : index
    %c0_30 = arith.constant 0 : index
    %55 = vector.load %arg6[%c0_29, %c0_30] : memref<33x128xf32, #tpu.memory_space<vmem>>, vector<33x128xf32>
    tpu.vector_store %arg6[%c0_29, %c0_30], %54 {strides = array<i32>} : memref<33x128xf32, #tpu.memory_space<vmem>>, vector<33x128xf32>,
    return
  }
}

</mosaic_0001>

<bundles_post_ra>
// kernel: stgcn_block_forward.1
= control target key start
LH: loop header
LB: loop body
LE: loop exit
PB: predicated region body
PF: predicated region fallthrough
CT: control target
= control target key end

     0   :  { %11 = vsyncpa [#allocation3], 0  ;;  %s1822_s0 = inlined_call_operand.hbm [shape: f32[64,33], index: 0, kind: input, shape index: {}]   ;;  %s1823_s1 = inlined_call_operand.hbm [shape: f32[33,33], index: 1, kind: input, shape index: {}]   ;;  %s1824_s2 = inlined_call_operand.hbm [shape: bf16[128,128], index: 2, kind: input, shape index: {}]   ;;  %s1825_s3 = inlined_call_operand.hbm [shape: bf16[128,128], index: 3, kind: input, shape index: {}]   ;;  %s1826_s4 = inlined_call_operand.hbm [shape: f32[128,128], index: 4, kind: input, shape index: {}]   ;;  %s1827_s5 = inlined_call_operand.vmem [shape: f32[5,128], index: 5, kind: input, shape index: {}]   ;;  %s1828_s6 = inlined_call_operand.vmem [shape: f32[33,128], index: 6, kind: output, shape index: {}]  }
   0x1   :  { %12 = vsyncpa [#allocation5], 0 }
   0x2   :  { %13 = vsyncpa [#allocation8], 0  ;;  %s1507_s21 = smov [#allocation4]   ;;  %s1391_s25 = scalar_lea.hbm %s1823_s1, 640 }
   0x3   :  { %s31_s22 = sshll.u32 %s1507_s21, 4  ;;  %p1392_p0 = scmp.ne.s32.totalorder %s1823_s1, %s1391_s25  ;;  %s32_s22 = int_to_ptr.vmem [resolvable:$true] %s31_s22 }
   0x4   :  { %p1395_p1 = scmp.lt.u32.totalorder %s1391_s25, %s1823_s1 }
   0x6   :  { %p1397_p2 = pnand %p1395_p1, %p1392_p0 }
   0x8   :  { %1400 = shalt.err (!%p1397_p2)
}
   0x9   :  { %s1401_s30 = scalar_lea.vmem %s32_s22, 640  ;;  %p1406_p4 = scmp.lt.s32.totalorder %s32_s22, %s32_s22 }
   0xa   :  { %p1402_p3 = scmp.ne.s32.totalorder %s32_s22, %s1401_s30  ;;  %p1407_p5 = scmp.lt.s32.totalorder %s1401_s30, %s1401_s30 }
   0xc   :  { %p1408_p6 = por %p1407_p5, %p1406_p4 }
   0xe   :  { %p1409_p7 = pnand %p1408_p6, %p1402_p3 }
  0x10   :  { %1412 = shalt.err (!%p1409_p7)
}
  0x11   :  { %s1508_s7 = smov 128   ;;  %s1509_s8 = smov 8  }
  0x12   :  { %37 = dma.hbm_to_vmem [thread:$0]  %s1823_s1, 640, %s32_s22, [#allocation5], %s1508_s7, %s1508_s7, %s1509_s8  }
  0x13   :  { %s1510_s11 = smov [#allocation7]   ;;  %s1511_s13 = smov [#allocation2]  }
  0x14   :  { %s55_s12 = sshll.u32 %s1510_s11, 4  ;;  %s19_s14 = sshll.u32 %s1511_s13, 4  ;;  %s56_s12 = int_to_ptr.vmem [resolvable:$true] %s55_s12  ;;  %s20_s14 = int_to_ptr.vmem [resolvable:$true] %s19_s14 }
  0x15   :  { %s1413_s17 = scalar_lea.hbm %s1825_s3, 1024 }
  0x16   :  { %p1414_p8 = scmp.ne.s32.totalorder %s1825_s3, %s1413_s17  ;;  %p1417_p9 = scmp.lt.u32.totalorder %s1413_s17, %s1825_s3 }
  0x18   :  { %p1419_p10 = pnand %p1417_p9, %p1414_p8 }
  0x1a   :  { %1422 = shalt.err (!%p1419_p10)
}
  0x1b   :  { %s1423_s1 = scalar_lea.vmem %s56_s12, 1024  ;;  %p1428_p12 = scmp.lt.s32.totalorder %s56_s12, %s56_s12 }
  0x1c   :  { %p1424_p11 = scmp.ne.s32.totalorder %s56_s12, %s1423_s1  ;;  %p1429_p13 = scmp.lt.s32.totalorder %s1423_s1, %s1423_s1 }
  0x1e   :  { %p1430_p0 = por %p1429_p13, %p1428_p12 }
  0x20   :  { %p1431_p1 = pnand %p1430_p0, %p1424_p11 }
  0x22   :  { %1434 = shalt.err (!%p1431_p1)
}
  0x23   :  { %s1512_s22 = smov 64   ;;  %s1513_s23 = smov 4  }
  0x24   :  { %61 = dma.hbm_to_vmem [thread:$0]  %s1825_s3, 1024, %s56_s12, [#allocation8], %s1512_s22, %s1512_s22, %s1513_s23  }
  0x25   :  { %s1435_s28 = scalar_lea.hbm %s1822_s0, 1024 }
  0x26   :  { %p1436_p2 = scmp.ne.s32.totalorder %s1822_s0, %s1435_s28  ;;  %p1439_p3 = scmp.lt.u32.totalorder %s1435_s28, %s1822_s0 }
  0x28   :  { %p1441_p4 = pnand %p1439_p3, %p1436_p2 }
  0x2a   :  { %1444 = shalt.err (!%p1441_p4)
}
  0x2b   :  { %s1445_s11 = scalar_lea.vmem %s20_s14, 1024  ;;  %p1450_p6 = scmp.lt.s32.totalorder %s20_s14, %s20_s14 }
  0x2c   :  { %p1446_p5 = scmp.ne.s32.totalorder %s20_s14, %s1445_s11  ;;  %p1451_p7 = scmp.lt.s32.totalorder %s1445_s11, %s1445_s11 }
  0x2e   :  { %p1452_p8 = por %p1451_p7, %p1450_p6 }
  0x30   :  { %p1453_p9 = pnand %p1452_p8, %p1446_p5 }
  0x32   :  { %1456 = shalt.err (!%p1453_p9)
}
  0x33   :  { %25 = dma.hbm_to_vmem [thread:$0]  %s1822_s0, 1024, %s20_s14, [#allocation3], %s1508_s7, %s1508_s7, %s1509_s8  }
  0x34   :  { %s1514_s13 = smov [#allocation6]   ;;  %s1515_s16 = smov [#allocation9]  }
  0x35   :  { %s43_s15 = sshll.u32 %s1514_s13, 4  ;;  %s67_s17 = sshll.u32 %s1515_s16, 4  ;;  %s44_s15 = int_to_ptr.vmem [resolvable:$true] %s43_s15  ;;  %s68_s17 = int_to_ptr.vmem [resolvable:$true] %s67_s17 }
  0x36   :  { %s1457_s20 = scalar_lea.hbm %s1824_s2, 1024 }
  0x37   :  { %p1458_p10 = scmp.ne.s32.totalorder %s1824_s2, %s1457_s20  ;;  %p1461_p11 = scmp.lt.u32.totalorder %s1457_s20, %s1824_s2 }
  0x39   :  { %p1463_p12 = pnand %p1461_p11, %p1458_p10 }
  0x3b   :  { %1466 = shalt.err (!%p1463_p12)
}
  0x3c   :  { %s1467_s0 = scalar_lea.vmem %s44_s15, 1024  ;;  %p1472_p0 = scmp.lt.s32.totalorder %s44_s15, %s44_s15 }
  0x3d   :  { %p1468_p13 = scmp.ne.s32.totalorder %s44_s15, %s1467_s0  ;;  %p1473_p1 = scmp.lt.s32.totalorder %s1467_s0, %s1467_s0 }
  0x3f   :  { %p1474_p2 = por %p1473_p1, %p1472_p0 }
  0x41   :  { %p1475_p3 = pnand %p1474_p2, %p1468_p13 }
  0x43   :  { %1478 = shalt.err (!%p1475_p3)
}
  0x44   :  { %49 = dma.hbm_to_vmem [thread:$0]  %s1824_s2, 1024, %s44_s15, [#allocation5], %s1512_s22, %s1512_s22, %s1513_s23  }
  0x45   :  { %s1479_s29 = scalar_lea.hbm %s1826_s4, 2048 }
  0x46   :  { %p1480_p4 = scmp.ne.s32.totalorder %s1826_s4, %s1479_s29  ;;  %p1483_p5 = scmp.lt.u32.totalorder %s1479_s29, %s1826_s4 }
  0x48   :  { %p1485_p6 = pnand %p1483_p5, %p1480_p4 }
  0x4a   :  { %1488 = shalt.err (!%p1485_p6)
}
  0x4b   :  { %s1489_s3 = scalar_lea.vmem %s68_s17, 2048  ;;  %p1494_p8 = scmp.lt.s32.totalorder %s68_s17, %s68_s17 }
  0x4c   :  { %p1490_p7 = scmp.ne.s32.totalorder %s68_s17, %s1489_s3  ;;  %p1495_p9 = scmp.lt.s32.totalorder %s1489_s3, %s1489_s3 }
  0x4e   :  { %p1496_p10 = por %p1495_p9, %p1494_p8 }
  0x50   :  { %p1497_p11 = pnand %p1496_p10, %p1490_p7 }
  0x52   :  { %1500 = shalt.err (!%p1497_p11)
}
  0x53   :  { %73 = dma.hbm_to_vmem [thread:$0]  %s1826_s4, 2048, %s68_s17, [#allocation8], %s1508_s7, %s1508_s7, %s1509_s8  }
  0x54   :  { %1501 = dma.done.wait [#allocation3], 1024  }
  0x55   :  { %1502 = vsyncadd [#allocation3], 4294966272 }
  0x56   :  { %1503 = dma.done.wait [#allocation5], 1664  }
  0x57   :  { %1504 = vsyncadd [#allocation5], 4294965632 }
  0x58   :  { %1505 = dma.done.wait [#allocation8], 3072  }
  0x59   :  { %1506 = vsyncadd [#allocation8], 4294964224  ;;  %v1516_v0 = vmov 0.0|0.0   ;;  %vm1517_vm0 = vmmov 0   ;;  %v1518_v1 = vmov 0.0   ;;  %vm123_vm1 = vcmask 269312  }
  0x5a   :  { %1297 = vmatprep.subr.bf16.mxu1 %v1516_v0  ;;  %1128 = vmatprep.mubr.msk.f32.mxu1 %vm1517_vm0, %v1518_v1  ;;  %v92_v2 = vld [vmem:[#allocation2] sm:$0xff]  ;;  %v93_v3 = vld [vmem:[#allocation2 + $0x8] sm:$0xff]  ;;  %vm1637_vm2 = vmpackc.low %vm123_vm1, %vm123_vm1  ;;  %v100_v24 = vlaneseq  ;;  %vm406_vm7 = vcmask 523264   ;;  %vm712_vm9 = vcmask 1040384  }
  0x5b   :  { %1281 = vmatprep.subr.bf16.mxu0 %v1516_v0  ;;  %1097 = vmatprep.mubr.msk.f32.mxu0 %vm1517_vm0, %v1518_v1  ;;  %v1282_v5 = vpack.c.bf16 %v93_v3, %v92_v2  ;;  %v94_v6 = vld [vmem:[#allocation2 + $0x10] sm:$0xff]  ;;  %v95_v7 = vld [vmem:[#allocation2 + $0x18] sm:$0xff]  ;;  %v96_v9 = vld [vmem:[#allocation2 + $0x20] sm:$0xff] }
  0x5c   :  { %v1286_v8 = vpack.c.bf16 %v95_v7, %v94_v6  ;;  %v97_v10 = vld [vmem:[#allocation2 + $0x28] sm:$0xff]  ;;  %v98_v12 = vld [vmem:[#allocation2 + $0x30] sm:$0xff]  ;;  %v99_v13 = vld [vmem:[#allocation2 + $0x38] sm:$0xff]  ;;  %v1684_v25 = vshrl.u32 %v100_v24, 7  ;;  %v107_v26 = vand.u32 127, %v100_v24 }
  0x5d   :  { %1300 = vmatpush3.bf16.xpose.msk.msra.mxu1 %vm1637_vm2, %v1282_v5  ;;  %1284 = vmatpush3.bf16.xpose.msk.msra.mxu0 %vm1637_vm2, %v1282_v5  ;;  %v1290_v11 = vpack.c.bf16 %v97_v10, %v96_v9  ;;  %v1294_v14 = vpack.c.bf16 %v99_v13, %v98_v12  ;;  %v253_v15 = vld [vmem:[#allocation4] sm:$0xff]  ;;  %v1373_v16 = vld [vmem:[#allocation6 + $0x20] sm:$0xff]   ;;  %v1374_v18 = vld [vmem:[#allocation6 + $0x28] sm:$0xff]  }
  0x5e   :  { %1301 = vmatprep.subr.bf16.mxu1 %v1516_v0  ;;  %1285 = vmatprep.subr.bf16.mxu0 %v1516_v0  ;;  %v254_v17 = vld [vmem:[#allocation4 + $0x8] sm:$0xff]  ;;  %v255_v19 = vld [vmem:[#allocation4 + $0x10] sm:$0xff]  ;;  %v1375_v20 = vld [vmem:[#allocation6 + $0x30] sm:$0xff]   ;;  %vm108_vm3 = vcmp.eq.s32.totalorder %v1684_v25, %v107_v26  ;;  %v102_v28 = vadd.s32 8, %v1684_v25  ;;  %v103_v29 = vadd.s32 16, %v1684_v25  ;;  %v104_v33 = vadd.s32 24, %v1684_v25 }
  0x5f   :  { %v256_v21 = vld [vmem:[#allocation4 + $0x18] sm:$0xff]  ;;  %v257_v22 = vld [vmem:[#allocation4 + $0x20] sm:$0x1]  ;;  %v1377_v27 = vld [vmem:[#allocation7] sm:$0xff]   ;;  %v940_v30 = vsel %vm108_vm3, 1.0, %v1518_v1  ;;  %v105_v53 = vadd.s32 32, %v1684_v25 }
  0x60   :  { %v1376_v23 = vld [vmem:[#allocation6 + $0x38] sm:$0xff]   ;;  %vm109_vm4 = vcmp.eq.s32.totalorder %v102_v28, %v107_v26  ;;  %v1378_v32 = vld [vmem:[#allocation7 + $0x8] sm:$0xff]   ;;  %vm110_vm5 = vcmp.eq.s32.totalorder %v103_v29, %v107_v26  ;;  %v1379_v34 = vld [vmem:[#allocation7 + $0x10] sm:$0xff]   ;;  %vm111_vm6 = vcmp.eq.s32.totalorder %v104_v33, %v107_v26 }
  0x61   :  { %v941_v31 = vsel %vm109_vm4, 1.0, %v1518_v1  ;;  %v942_v35 = vsel %vm110_vm5, 1.0, %v1518_v1  ;;  %v1380_v36 = vld [vmem:[#allocation7 + $0x18] sm:$0xff]   ;;  %v943_v37 = vsel %vm111_vm6, 1.0, %v1518_v1  ;;  %v1381_v38 = vld [vmem:[#allocation7 + $0x20] sm:$0xff]   ;;  %v1382_v39 = vld [vmem:[#allocation7 + $0x28] sm:$0xff]   ;;  %vm112_vm8 = vcmp.eq.s32.totalorder %v105_v53, %v107_v26 }
  0x62   :  { %v1383_v54 = vld [vmem:[#allocation7 + $0x30] sm:$0xff]   ;;  %v944_v55 = vsel %vm112_vm8, 1.0, %v1518_v1  ;;  %v1384_v56 = vld [vmem:[#allocation7 + $0x38] sm:$0xff]   ;;  %v1385_v57 = vld [vmem:[#allocation6] sm:$0xff]  }
  0x63   :  { %v1386_v60 = vld [vmem:[#allocation6 + $0x8] sm:$0xff]   ;;  %v1387_v3 = vld [vmem:[#allocation6 + $0x10] sm:$0xff]   ;;  %v1388_v6 = vld [vmem:[#allocation6 + $0x18] sm:$0xff]  }
  0x64   :  { %v971_v9 = vld [vmem:[%s1827_s5 + $0x1] ss:$0 sm:$0xff]  ;;  %v747_v53 = vld [vmem:[#allocation9 + $0x50] sm:$0xff] }
  0x65   :  { %1304 = vmatpush3.bf16.xpose.msk.msra.mxu1 %vm1637_vm2, %v1286_v8  ;;  %1288 = vmatpush3.bf16.xpose.msk.msra.mxu0 %vm1637_vm2, %v1286_v8 }
  0x66   :  { %1305 = vmatprep.subr.bf16.mxu1 %v1516_v0  ;;  %1289 = vmatprep.subr.bf16.mxu0 %v1516_v0 }
  0x6d   :  { %1308 = vmatpush3.bf16.xpose.msk.msra.mxu1 %vm1637_vm2, %v1290_v11  ;;  %1292 = vmatpush3.bf16.xpose.msk.msra.mxu0 %vm1637_vm2, %v1290_v11 }
  0x6e   :  { %1309 = vmatprep.subr.bf16.mxu1 %v1516_v0  ;;  %1293 = vmatprep.subr.bf16.mxu0 %v1516_v0 }
  0x75   :  { %1312 = vmatpush3.bf16.xpose.msk.msra.mxu1 %vm1637_vm2, %v1294_v14  ;;  %1296 = vmatpush3.bf16.xpose.msk.msra.mxu0 %vm1637_vm2, %v1294_v14 }
  0x76   :  { %1143 = vmatprep.subr.bf16.mxu1 %v1518_v1  ;;  %1183 = vmatprep.subr.bf16.mxu0 %v1518_v1 }
  0x7c   :  { %1129 = vmatmul.mubr.msk.f32.vlgmr.msra.gmra.mrb[0].mxu1 %vm123_vm1, %v253_v15  ;;  %1098 = vmatmul.mubr.msk.f32.vlgmr.msra.gmra.mrb[0].mxu0 %vm123_vm1, %v940_v30 }
  0x7d   :  { %1131 = vmatprep.mubr.msk.f32.mxu1 %vm1517_vm0, %v1518_v1  ;;  %1144 = vmatpush3.bf16.msra.mxu1 %v1373_v16 }
  0x7e   :  { %1145 = vmatprep.subr.bf16.mxu1 %v1518_v1  ;;  %1100 = vmatprep.mubr.msk.f32.mxu0 %vm1517_vm0, %v1518_v1 }
  0x7f   :  { %1184 = vmatpush3.bf16.msra.mxu0 %v1377_v27 }
  0x80   :  { %1132 = vmatmul.mubr.msk.f32.gmra.mrb[2].mxu1 %vm123_vm1, %v254_v17  ;;  %1185 = vmatprep.subr.bf16.mxu0 %v1518_v1 }
  0x81   :  { %1134 = vmatprep.mubr.msk.f32.mxu1 %vm1517_vm0, %v1518_v1  ;;  %1146 = vmatpush3.bf16.msra.mxu1 %v1374_v18 }
  0x82   :  { %1147 = vmatprep.subr.bf16.mxu1 %v1518_v1  ;;  %1101 = vmatmul.mubr.msk.f32.gmra.mrb[2].mxu0 %vm123_vm1, %v941_v31 }
  0x83   :  { %1186 = vmatpush3.bf16.msra.mxu0 %v1378_v32  ;;  %1103 = vmatprep.mubr.msk.f32.mxu0 %vm1517_vm0, %v1518_v1 }
  0x84   :  { %1135 = vmatmul.mubr.msk.f32.gmra.mrb[4].mxu1 %vm123_vm1, %v255_v19  ;;  %1187 = vmatprep.subr.bf16.mxu0 %v1518_v1 }
  0x85   :  { %1137 = vmatprep.mubr.msk.f32.mxu1 %vm1517_vm0, %v1518_v1  ;;  %1148 = vmatpush3.bf16.msra.mxu1 %v1375_v20 }
  0x86   :  { %1149 = vmatprep.subr.bf16.mxu1 %v1518_v1  ;;  %1104 = vmatmul.mubr.msk.f32.gmra.mrb[4].mxu0 %vm123_vm1, %v942_v35 }
  0x87   :  { %1188 = vmatpush3.bf16.msra.mxu0 %v1379_v34  ;;  %1106 = vmatprep.mubr.msk.f32.mxu0 %vm1517_vm0, %v1518_v1 }
  0x88   :  { %1138 = vmatmul.mubr.msk.f32.gmra.mrb[6].mxu1 %vm123_vm1, %v256_v21  ;;  %1189 = vmatprep.subr.bf16.mxu0 %v1518_v1 }
  0x89   :  { %1140 = vmatprep.mubr.msk.f32.mxu1 %vm1517_vm0, %v1518_v1  ;;  %1150 = vmatpush3.bf16.msra.mxu1 %v1376_v23 }
  0x8a   :  { %1163 = vmatprep.subr.bf16.mxu1 %v1518_v1  ;;  %1107 = vmatmul.mubr.msk.f32.gmra.mrb[6].mxu0 %vm123_vm1, %v943_v37 }
  0x8b   :  { %1190 = vmatpush3.bf16.msra.mxu0 %v1380_v36  ;;  %1109 = vmatprep.mubr.msk.f32.mxu0 %vm1517_vm0, %v1518_v1 }
  0x8c   :  { %1141 = vmatmul.mubr.msk.f32.gmra.mrb[8].mxu1 %vm123_vm1, %v257_v22  ;;  %1191 = vmatprep.subr.bf16.mxu0 %v1518_v1 }
  0x8d   :  { %1151 = vmatprep.mubr.msk.bf16.mxu1 %vm1517_vm0, %v1518_v1 }
  0x8e   :  { %1110 = vmatmul.mubr.msk.f32.gmra.mrb[8].mxu0 %vm123_vm1, %v944_v55 }
  0x8f   :  { %1192 = vmatpush3.bf16.msra.mxu0 %v1381_v38  ;;  %1199 = vmatprep.mubr.msk.bf16.mxu0 %vm1517_vm0, %v1518_v1 }
  0x90   :  { %1193 = vmatprep.subr.bf16.mxu0 %v1518_v1 }
  0x93   :  { %1194 = vmatpush3.bf16.msra.mxu0 %v1382_v39  ;;  %v737_v39 = vld [vmem:[#allocation9] sm:$0xff] }
  0x94   :  { %1195 = vmatprep.subr.bf16.mxu0 %v1518_v1 }
  0x97   :  { %1196 = vmatpush3.bf16.msra.mxu0 %v1383_v54  ;;  %v748_v54 = vld [vmem:[#allocation9 + $0x58] sm:$0xff] }
  0x98   :  { %1197 = vmatprep.subr.bf16.mxu0 %v1518_v1  ;;  %v1329_v55 = vpack.c.bf16 %v748_v54, %v747_v53 }
  0x9b   :  { %1198 = vmatpush3.bf16.msra.mxu0 %v1384_v56  ;;  %v749_v56 = vld [vmem:[#allocation9 + $0x60] sm:$0xff] }
  0x9c   :  { %1337 = vmatprep.subr.bf16.mxu0 %v1516_v0 }
 0x14f   :  { %v339_v40 = vpop.f32.mrb[0].mxu1  ;;  %v229_v58 = vpop.f32.mrb[0].mxu0 }
 0x150   :  { %v1130_v41 = vpop.f32.mrb[1].mxu1  ;;  %v1099_v59 = vpop.f32.mrb[1].mxu0 }
 0x151   :  { %v751_v59 = vld [vmem:[#allocation9 + $0x70] sm:$0xff] }
 0x153   :  { %v344_v42 = vpop.f32.mrb[2].mxu1 }
 0x154   :  { %v367_v43 = vpack.c.bf16 %v344_v42, %v339_v40  ;;  %v1133_v44 = vpop.f32.mrb[3].mxu1  ;;  %v738_v40 = vld [vmem:[#allocation9 + $0x8] sm:$0xff]  ;;  %v739_v42 = vld [vmem:[#allocation9 + $0x10] sm:$0xff] }
 0x155   :  { %v234_v61 = vpop.f32.mrb[2].mxu0  ;;  %v1314_v41 = vpack.c.bf16 %v738_v40, %v737_v39 }
 0x156   :  { %1152 = vmatmul.mubr.msk.bf16.vlgmr.msra.gmra.mrb[12].mxu1 %vm406_vm7, %v367_v43  ;;  %v477_v62 = vpack.c.bf16 %v234_v61, %v229_v58  ;;  %v1102_v63 = vpop.f32.mrb[3].mxu0  ;;  %v740_v43 = vld [vmem:[#allocation9 + $0x18] sm:$0xff] }
 0x157   :  { %v349_v45 = vpop.f32.mrb[4].mxu1  ;;  %1155 = vmatprep.mubr.msk.bf16.mxu1 %vm1517_vm0, %v1518_v1  ;;  %1164 = vmatpush3.bf16.msra.mxu1 %v1385_v57  ;;  %v1317_v44 = vpack.c.bf16 %v740_v43, %v739_v42  ;;  %v750_v57 = vld [vmem:[#allocation9 + $0x68] sm:$0xff] }
 0x158   :  { %v1136_v46 = vpop.f32.mrb[5].mxu1  ;;  %1165 = vmatprep.subr.bf16.mxu1 %v1518_v1  ;;  %v1332_v58 = vpack.c.bf16 %v750_v57, %v749_v56 }
 0x159   :  { %v239_v2 = vpop.f32.mrb[4].mxu0  ;;  %v742_v46 = vld [vmem:[#allocation9 + $0x28] sm:$0xff] }
 0x15a   :  { %v1105_v4 = vpop.f32.mrb[5].mxu0 }
 0x15b   :  { %v354_v47 = vpop.f32.mrb[6].mxu1  ;;  %1166 = vmatpush3.bf16.msra.mxu1 %v1386_v60  ;;  %v752_v60 = vld [vmem:[#allocation9 + $0x78] sm:$0xff] }
 0x15c   :  { %v368_v48 = vpack.c.bf16 %v354_v47, %v349_v45  ;;  %v1139_v49 = vpop.f32.mrb[7].mxu1  ;;  %1167 = vmatprep.subr.bf16.mxu1 %v1518_v1  ;;  %v741_v45 = vld [vmem:[#allocation9 + $0x20] sm:$0xff]  ;;  %v743_v47 = vld [vmem:[#allocation9 + $0x30] sm:$0xff]  ;;  %v1335_v61 = vpack.c.bf16 %v752_v60, %v751_v59 }
 0x15d   :  { %v244_v5 = vpop.f32.mrb[6].mxu0 }
 0x15e   :  { %1156 = vmatmul.mubr.msk.bf16.gmra.mrb[16].mxu1 %vm406_vm7, %v368_v48  ;;  %v478_v7 = vpack.c.bf16 %v244_v5, %v239_v2  ;;  %v1108_v8 = vpop.f32.mrb[7].mxu0  ;;  %v744_v48 = vld [vmem:[#allocation9 + $0x38] sm:$0xff] }
 0x15f   :  { %v359_v50 = vpop.f32.mrb[8].mxu1  ;;  %1159 = vmatprep.mubr.msk.bf16.mxu1 %vm1517_vm0, %v1518_v1  ;;  %1168 = vmatpush3.bf16.msra.mxu1 %v1387_v3  ;;  %v1323_v49 = vpack.c.bf16 %v744_v48, %v743_v47 }
 0x160   :  { %v1142_v51 = vpop.f32.mrb[9].mxu1  ;;  %v369_v52 = vpack.c.bf16 %v359_v50, %v359_v50  ;;  %1169 = vmatprep.subr.bf16.mxu1 %v1518_v1  ;;  %v745_v50 = vld [vmem:[#allocation9 + $0x40] sm:$0xff] }
 0x161   :  { %v249_v36 = vpop.f32.mrb[8].mxu0  ;;  %v746_v51 = vld [vmem:[#allocation9 + $0x48] sm:$0xff] }
 0x162   :  { %v479_v37 = vpack.c.bf16 %v249_v36, %v249_v36  ;;  %v1111_v38 = vpop.f32.mrb[9].mxu0 }
 0x163   :  { %1170 = vmatpush3.bf16.msra.mxu1 %v1388_v6 }
 0x164   :  { %1313 = vmatprep.subr.bf16.mxu1 %v1516_v0 }
 0x166   :  { %1160 = vmatmul.mubr.msk.bf16.gmra.mrb[20].mxu1 %vm406_vm7, %v369_v52  ;;  %v1326_v52 = vpack.c.bf16 %v746_v51, %v745_v50 }
 0x167   :  { %1171 = vmatprep.mubr.msk.bf16.mxu1 %vm1517_vm0, %v1518_v1 }
 0x16e   :  { %1172 = vmatmul.mubr.msk.bf16.vlgmr.msra.gmra.mrb[24].mxu1 %vm406_vm7, %v477_v62 }
 0x16f   :  { %1175 = vmatprep.mubr.msk.bf16.mxu1 %vm1517_vm0, %v1518_v1  ;;  %1315 = vmatpush3.bf16.msra.mxu1 %v1314_v41 }
 0x170   :  { %1316 = vmatprep.subr.bf16.mxu1 %v1516_v0 }
 0x173   :  { %1318 = vmatpush3.bf16.msra.mxu1 %v1317_v44 }
 0x174   :  { %1319 = vmatprep.subr.bf16.mxu1 %v1516_v0 }
 0x176   :  { %1176 = vmatmul.mubr.msk.bf16.gmra.mrb[28].mxu1 %vm406_vm7, %v478_v7 }
 0x177   :  { %1179 = vmatprep.mubr.msk.bf16.mxu1 %vm1517_vm0, %v1518_v1 }
 0x17e   :  { %1180 = vmatmul.mubr.msk.bf16.gmra.mrb[32].mxu1 %vm406_vm7, %v479_v37 }
 0x17f   :  { %1243 = vmatprep.mubr.msk.f32.mxu1 %vm1517_vm0, %v1518_v1 }
 0x229   :  { %v450_v10 = vpop.f32.mrb[12].mxu1 }
 0x22a   :  { %v451_v11 = vadd.f32 %v971_v9, %v450_v10  ;;  %v1153_v12 = vpop.f32.mrb[13].mxu1 }
 0x22b   :  { %v453_v13 = vpop.f32.mrb[14].mxu1 }
 0x22c   :  { %v454_v14 = vadd.f32 %v971_v9, %v453_v13  ;;  %v1154_v15 = vpop.f32.mrb[15].mxu1  ;;  %v472_v16 = vmax.f32 %v451_v11, 0.0 }
 0x22e   :  { %v473_v17 = vmax.f32 %v454_v14, 0.0 }
 0x230   :  { %v582_v18 = vpack.c.bf16 %v473_v17, %v472_v16 }
 0x231   :  { %v458_v19 = vpop.f32.mrb[16].mxu1 }
 0x232   :  { %v459_v20 = vadd.f32 %v971_v9, %v458_v19  ;;  %v1157_v21 = vpop.f32.mrb[17].mxu1  ;;  %1200 = vmatmul.mubr.bf16.vlgmr.msra.gmra.mrb[12].mxu0 %v582_v18 }
 0x233   :  { %v461_v22 = vpop.f32.mrb[18].mxu1  ;;  %1203 = vmatprep.mubr.msk.bf16.mxu0 %vm1517_vm0, %v1518_v1  ;;  %1339 = vmatpush3.bf16.msra.mxu0 %v1314_v41 }
 0x234   :  { %v462_v23 = vadd.f32 %v971_v9, %v461_v22  ;;  %v1158_v24 = vpop.f32.mrb[19].mxu1  ;;  %v474_v26 = vmax.f32 %v459_v20, 0.0  ;;  %1340 = vmatprep.subr.bf16.mxu0 %v1516_v0 }
 0x236   :  { %v475_v27 = vmax.f32 %v462_v23, 0.0 }
 0x237   :  { %1342 = vmatpush3.bf16.msra.mxu0 %v1317_v44 }
 0x238   :  { %v583_v28 = vpack.c.bf16 %v475_v27, %v474_v26  ;;  %1343 = vmatprep.subr.bf16.mxu0 %v1516_v0 }
 0x239   :  { %v466_v29 = vpop.f32.mrb[20].mxu1 }
 0x23a   :  { %v467_v30 = vadd.f32 %v971_v9, %v466_v29  ;;  %v1161_v31 = vpop.f32.mrb[21].mxu1  ;;  %1204 = vmatmul.mubr.bf16.gmra.mrb[16].mxu0 %v583_v28 }
 0x23b   :  { %v469_v32 = vpop.f32.mrb[22].mxu1  ;;  %1207 = vmatprep.mubr.msk.bf16.mxu0 %vm1517_vm0, %v1518_v1 }
 0x23c   :  { %v476_v33 = vmax.f32 %v467_v30, 0.0  ;;  %v1162_v34 = vpop.f32.mrb[23].mxu1 }
 0x23e   :  { %v584_v35 = vpack.c.bf16 %v476_v33, %v476_v33 }
 0x241   :  { %v1764_v62 = vpop.f32.mrb[24].mxu1 }
 0x242   :  { %1208 = vmatmul.mubr.bf16.gmra.mrb[20].mxu0 %v584_v35  ;;  %v1173_v63 = vpop.f32.mrb[25].mxu1 }
 0x243   :  { %1278 = vmatprep.mubr.msk.f32.mxu0 %vm1517_vm0, %v1518_v1  ;;  %v1320_v1 = vpack.c.bf16 %v742_v46, %v741_v45  ;;  %v1766_v2 = vpop.f32.mrb[26].mxu1 }
 0x244   :  { %v1174_v3 = vpop.f32.mrb[27].mxu1 }
 0x245   :  { %1321 = vmatpush3.bf16.msra.mxu1 %v1320_v1  ;;  %1345 = vmatpush3.bf16.msra.mxu0 %v1320_v1  ;;  %v365_v3 = vld [vmem:[%s1827_s5 + $0x3] sm:$0x1] }
 0x246   :  { %1322 = vmatprep.subr.bf16.mxu1 %v1516_v0  ;;  %1346 = vmatprep.subr.bf16.mxu0 %v1516_v0 }
 0x249   :  { %1324 = vmatpush3.bf16.msra.mxu1 %v1323_v49  ;;  %1348 = vmatpush3.bf16.msra.mxu0 %v1323_v49  ;;  %v1768_v4 = vpop.f32.mrb[28].mxu1 }
 0x24a   :  { %1325 = vmatprep.subr.bf16.mxu1 %v1516_v0  ;;  %1349 = vmatprep.subr.bf16.mxu0 %v1516_v0  ;;  %v1177_v5 = vpop.f32.mrb[29].mxu1 }
 0x24b   :  { %v1770_v6 = vpop.f32.mrb[30].mxu1  ;;  %v902_v5 = vsub.s32 0, %v1684_v25 }
 0x24c   :  { %v1178_v7 = vpop.f32.mrb[31].mxu1 }
 0x24d   :  { %1327 = vmatpush3.bf16.msra.mxu1 %v1326_v52  ;;  %1351 = vmatpush3.bf16.msra.mxu0 %v1326_v52 }
 0x24e   :  { %1328 = vmatprep.subr.bf16.mxu1 %v1516_v0  ;;  %1352 = vmatprep.subr.bf16.mxu0 %v1516_v0 }
 0x251   :  { %1330 = vmatpush3.bf16.msra.mxu1 %v1329_v55  ;;  %1354 = vmatpush3.bf16.msra.mxu0 %v1329_v55  ;;  %v576_v52 = vpop.f32.mrb[32].mxu1 }
 0x252   :  { %1331 = vmatprep.subr.bf16.mxu1 %v1516_v0  ;;  %1355 = vmatprep.subr.bf16.mxu0 %v1516_v0  ;;  %v1181_v53 = vpop.f32.mrb[33].mxu1 }
 0x253   :  { %v579_v54 = vpop.f32.mrb[34].mxu1 }
 0x254   :  { %v1182_v55 = vpop.f32.mrb[35].mxu1 }
 0x255   :  { %1333 = vmatpush3.bf16.msra.mxu1 %v1332_v58  ;;  %1357 = vmatpush3.bf16.msra.mxu0 %v1332_v58 }
 0x256   :  { %1334 = vmatprep.subr.bf16.mxu1 %v1516_v0  ;;  %1358 = vmatprep.subr.bf16.mxu0 %v1516_v0  ;;  %v987_v0 = vld [vmem:[%s1827_s5 + $0x2] ss:$0 sm:$0xff] }
 0x259   :  { %1336 = vmatpush3.bf16.msra.mxu1 %v1335_v61  ;;  %1360 = vmatpush3.bf16.msra.mxu0 %v1335_v61 }
 0x305   :  { %v687_v8 = vpop.f32.mrb[12].mxu0 }
 0x306   :  { %v1201_v9 = vpop.f32.mrb[13].mxu0  ;;  %v1777_v13 = vadd.f32 %v987_v0, %v687_v8 }
 0x307   :  { %v690_v10 = vpop.f32.mrb[14].mxu0  ;;  %v366_v9 = vld [vmem:[%s1827_s5 + $0x4] sm:$0x1] }
 0x308   :  { %v1202_v11 = vpop.f32.mrb[15].mxu0  ;;  %v1775_v12 = vadd.f32 %v987_v0, %v690_v10  ;;  %v721_v20 = vmul.f32 %v1777_v13, %v1777_v13 }
 0x30a   :  { %v722_v17 = vmul.f32 %v1775_v12, %v1775_v12  ;;  %v709_v21 = vadd.f32 %v1775_v12, %v1777_v13 }
 0x30c   :  { %v726_v24 = vadd.f32 %v722_v17, %v721_v20 }
 0x30d   :  { %v695_v14 = vpop.f32.mrb[16].mxu0 }
 0x30e   :  { %v1779_v15 = vadd.f32 %v987_v0, %v695_v14  ;;  %v1205_v16 = vpop.f32.mrb[17].mxu0 }
 0x30f   :  { %v698_v18 = vpop.f32.mrb[18].mxu0 }
 0x310   :  { %v1206_v19 = vpop.f32.mrb[19].mxu0  ;;  %v723_v22 = vmul.f32 %v1779_v15, %v1779_v15  ;;  %v699_v23 = vadd.f32 %v987_v0, %v698_v18  ;;  %v710_v26 = vadd.f32 %v709_v21, %v1779_v15 }
 0x312   :  { %v727_v27 = vadd.f32 %v726_v24, %v723_v22  ;;  %v724_v28 = vmul.f32 %v699_v23, %v699_v23  ;;  %v711_v32 = vadd.f32 %v710_v26, %v699_v23 }
 0x314   :  { %v728_v37 = vadd.f32 %v727_v27, %v724_v28 }
 0x315   :  { %v703_v29 = vpop.f32.mrb[20].mxu0 }
 0x316   :  { %v704_v30 = vadd.f32 %v987_v0, %v703_v29  ;;  %v1209_v31 = vpop.f32.mrb[21].mxu0  ;;  %v979_v0 = vld [vmem:[%s1827_s5] ss:$0 sm:$0xff] }
 0x317   :  { %v706_v33 = vpop.f32.mrb[22].mxu0  ;;  %v561_v20 = vadd.f32 %v979_v0, %v1764_v62  ;;  %v564_v28 = vadd.f32 %v979_v0, %v1766_v2  ;;  %v569_v29 = vadd.f32 %v979_v0, %v1768_v4  ;;  %v572_v31 = vadd.f32 %v979_v0, %v1770_v6 }
 0x318   :  { %v713_v34 = vsel %vm712_vm9, %v704_v30, 0.0  ;;  %v725_v35 = vmul.f32 %v704_v30, %v704_v30  ;;  %v1210_v36 = vpop.f32.mrb[23].mxu0 }
 0x319   :  { %v714_v38 = vadd.f32 %v713_v34, %v711_v32 }
 0x31a   :  { %v729_v39 = vsel %vm712_vm9, %v725_v35, 0.0 }
 0x31b   :  { %v715_v40 = vrot.slane %v714_v38, 4  ;;  %v730_v41 = vadd.f32 %v729_v39, %v728_v37 }
 0x31d   :  { %v716_v42 = vadd.f32 %v715_v40, %v714_v38  ;;  %v731_v43 = vrot.slane %v730_v41, 4 }
 0x31f   :  { %v717_v44 = vrot.slane %v716_v42, 2  ;;  %v732_v45 = vadd.f32 %v731_v43, %v730_v41 }
 0x321   :  { %v718_v46 = vadd.f32 %v717_v44, %v716_v42  ;;  %v733_v1 = vrot.slane %v732_v45, 2 }
 0x323   :  { %v719_v47 = vrot.slane %v718_v46, 1  ;;  %v734_v48 = vadd.f32 %v733_v1, %v732_v45 }
 0x325   :  { %v720_v49 = vadd.f32 %v719_v47, %v718_v46  ;;  %v735_v50 = vrot.slane %v734_v48, 1 }
 0x327   :  { %1244 = vmatmul.mubr.f32.vlgmr.msra.gmra.mrb[10].mxu1 %v720_v49  ;;  %v736_v51 = vadd.f32 %v735_v50, %v734_v48 }
 0x329   :  { %1279 = vmatmul.mubr.f32.vlgmr.msra.gmra.mrb[10].mxu0 %v736_v51 }
 0x3fa   :  { %v819_v56 = vpop.f32.mrb[10].mxu1 }
 0x3fb   :  { %v893_v57 = vmul.f32 %v819_v56, %v819_v56  ;;  %v1245_v58 = vpop.f32.mrb[11].mxu1 }
 0x3fc   :  { %v889_v59 = vpop.f32.mrb[10].mxu0 }
 0x3fd   :  { %v894_v60 = vsub.f32 %v889_v59, %v893_v57  ;;  %v1280_v61 = vpop.f32.mrb[11].mxu0 }
 0x3ff   :  { %v895_v63 = vadd.f32 1e-05, %v894_v60 }
 0x401   :  { %1389 = vrsqrt.f32 %v895_v63 }
 0x40b   :  { %v1390_v7 = vpop.eup %1389 }
 0x40c   :  { %v897_v8 = vmul.f32 %v1390_v7, %v365_v3 }
 0x40e   :  { %v898_v10 = vmul.f32 %v897_v8, %v819_v56  ;;  %v903_v11 = vrot.slane %v897_v8, %v902_v5 }
 0x410   :  { %v899_v14 = vsub.f32 %v366_v9, %v898_v10  ;;  %v904_v16 = vmul.f32 %v903_v11, %v1777_v13  ;;  %v905_v17 = vmul.f32 %v903_v11, %v1775_v12  ;;  %v906_v18 = vmul.f32 %v903_v11, %v1779_v15 }
 0x411   :  { %v907_v25 = vmul.f32 %v903_v11, %v699_v23  ;;  %v908_v21 = vmul.f32 %v903_v11, %v704_v30  ;;  %v577_v23 = vadd.f32 %v979_v0, %v576_v52 }
 0x412   :  { %v912_v19 = vrot.slane %v899_v14, %v902_v5 }
 0x414   :  { %v913_v22 = vadd.f32 %v912_v19, %v904_v16  ;;  %v914_v24 = vadd.f32 %v912_v19, %v905_v17  ;;  %v915_v26 = vadd.f32 %v912_v19, %v906_v18  ;;  %v916_v27 = vadd.f32 %v912_v19, %v907_v25 }
 0x415   :  { %v917_v13 = vadd.f32 %v912_v19, %v908_v21 }
 0x416   :  { %v918_v32 = vmax.f32 %v913_v22, 0.0  ;;  %v919_v12 = vmax.f32 %v914_v24, 0.0  ;;  %v920_v33 = vmax.f32 %v915_v26, 0.0  ;;  %v921_v15 = vmax.f32 %v916_v27, 0.0 }
 0x417   :  { %v922_v34 = vmax.f32 %v917_v13, 0.0 }
 0x418   :  { %v923_v35 = vadd.f32 %v918_v32, %v561_v20  ;;  %v924_v62 = vadd.f32 %v919_v12, %v564_v28  ;;  %v925_v30 = vadd.f32 %v920_v33, %v569_v29  ;;  %v926_v36 = vadd.f32 %v921_v15, %v572_v31 }
 0x419   :  { %v927_v37 = vadd.f32 %v922_v34, %v577_v23 }
 0x41a   :  { %928 = vst [vmem:[%s1828_s6] sm:$0xff] %v923_v35  ;;  %929 = vst [vmem:[%s1828_s6 + $0x8] sm:$0xff] %v924_v62 }
 0x41b   :  { %930 = vst [vmem:[%s1828_s6 + $0x10] sm:$0xff] %v925_v30  ;;  %931 = vst [vmem:[%s1828_s6 + $0x18] sm:$0xff] %v926_v36 }
 0x41c   :  { %932 = vst [vmem:[%s1828_s6 + $0x20] sm:$0x1] %v927_v37 }
 0x41d   :  { %937 = vsyncpa [#allocation3], 1 }
 0x41e   :  { %938 = vsyncpa [#allocation5], 1 }
 0x41f   :  { %939 = vsyncpa [#allocation8], 1 }

</bundles_post_ra>
